<compile_context>
chip_gen: v6e
topology: v6e:2x2x1
jax: 0.10.0
libtpu: 0.0.40
codegen_flags: <defaults>
</compile_context>

<pallas_src>
import jax
import jax.numpy as jnp
from jax.experimental import pallas as pl
from jax.experimental.pallas import tpu as pltpu


def _residual_block_kernel(x_ref, m1_ref, b1_ref, m2_ref, b2_ref, o_ref):
  # x_ref / o_ref: (1, H, WC) lane-dense f32 blocks (one image per grid step).
  # m*_ref: (WC, 3*WC) ky-fused banded BN-folded conv weights (f32 or bf16).
  # b*_ref: (1, WC) f32 folded bias, pre-broadcast over W.
  H, WC = x_ref.shape[1], x_ref.shape[2]

  x = x_ref[0]                                            # (H, WC) f32

  # Height-edge masks built once (iota/broadcast are not CSE'd by JAX).
  row = jax.lax.broadcasted_iota(jnp.int32, (H, WC), 0)
  top_edge = row == 0
  bot_edge = row == H - 1

  def conv3x3(inp, m_ref, b_ref):
    # Single fused matmul; columns are [ky=0 | ky=1 | ky=2], each WC wide.
    z = jnp.dot(inp.astype(m_ref.dtype), m_ref[...],
                preferred_element_type=jnp.float32)       # (H, 3*WC) f32
    z0 = z[:, :WC]                  # lane-aligned slices: free
    z1 = z[:, WC:2 * WC]
    z2 = z[:, 2 * WC:]
    # out[h] = z0[h-1] + z1[h] + z2[h+1], zero padding at the height edges.
    up = jnp.where(top_edge, 0.0, pltpu.roll(z0, shift=1, axis=0))
    down = jnp.where(bot_edge, 0.0, pltpu.roll(z2, shift=H - 1, axis=0))
    return z1 + up + down + b_ref[...]                    # bias is (1, WC)

  y1 = jnp.maximum(conv3x3(x, m1_ref, b1_ref), 0.0)       # conv1 + BN1 + ReLU
  y2 = conv3x3(y1, m2_ref, b2_ref)                        # conv2 + BN2
  o_ref[0] = jnp.maximum(x + y2, 0.0)                     # residual + ReLU


def _fold_bn_to_banded(w_oihw, conv_b, gamma, beta, mean, var, W, eps=1e-5):
  """Fold eval-mode BN into the conv and build per-ky banded weight matrices.

  Returns:
    M: (3, W*C, W*C) f32. M[ky] maps an input row laid out as (w*C + ci) to an
       output row laid out as (w*C + co): it implements the kx taps (with the
       width-1 zero padding) and the ci->co mixing of the BN-folded 3x3 conv.
    b: (1, W*C) f32 folded bias, pre-broadcast over W (lane-dense).
  """
  c_out, c_in = w_oihw.shape[0], w_oihw.shape[1]
  scale = gamma / jnp.sqrt(var + eps)                      # (C_out,)
  w_scaled = w_oihw * scale[:, None, None, None]           # (O, I, 3, 3)
  w_t = jnp.transpose(w_scaled, (2, 3, 1, 0))              # (ky, kx, Cin, Cout)
  mats = []
  for ky in range(3):
    m = jnp.zeros((W * c_in, W * c_out), jnp.float32)
    for kx in range(3):
      # Input column w' = w + kx - 1 feeds output column w (zero edges).
      shift = jnp.eye(W, k=1 - kx, dtype=jnp.float32)      # [w', w]
      m = m + jnp.kron(shift, w_t[ky, kx])
    mats.append(m)
  M = jnp.stack(mats, axis=0)                              # (3, W*C, W*C)
  b = (conv_b - mean) * scale + beta                       # (C_out,)
  b = jnp.tile(b, W)[None, :]                              # (1, W*C)
  return M, b


def fold_residual_block_params(w1, cb1, g1, be1, rm1, rv1,
                               w2, cb2, g2, be2, rm2, rv2, W,
                               matmul_dtype=jnp.float32, eps=1e-5):
  """ONE-TIME init (hoisted out of the forward): fold BN, band, and ky-fuse.

  The (3, WC, WC) banded matrices are lane-concatenated into (WC, 3*WC) so
  each conv is a single MXU matmul in the kernel.  `matmul_dtype=bf16` halves
  weight HBM traffic (recommended on v6e/v7x); biases stay f32.
  """
  def fuse(M):
    WC = M.shape[1]
    return jnp.transpose(M, (1, 0, 2)).reshape(WC, 3 * WC).astype(matmul_dtype)

  M1, b1 = _fold_bn_to_banded(w1, cb1, g1, be1, rm1, rv1, W, eps)
  M2, b2 = _fold_bn_to_banded(w2, cb2, g2, be2, rm2, rv2, W, eps)
  return fuse(M1), b1, fuse(M2), b2


@jax.jit
def residual_block_fwd(x_lane_dense, M1f, b1, M2f, b2):
  """Forward pass. x_lane_dense: (B, H, W*C) f32 (NHWC, channels on lanes)."""
  B, H, WC = x_lane_dense.shape

  w_bytes = (M1f.size * M1f.dtype.itemsize + M2f.size * M2f.dtype.itemsize)
  act_bytes = 4 * B * H * WC
  cost = pl.CostEstimate(
      flops=2 * (2 * B * H * WC * 3 * WC) + 8 * B * H * WC,
      transcendentals=0,
      bytes_accessed=2 * act_bytes + w_bytes + 2 * 4 * WC)

  # Per-step footprint (x + out blocks double-buffered; weights/bias resident)
  # plus headroom for in-kernel temporaries; clamp to v7x's 64 MiB VMEM.
  block_bytes = 2 * 4 * H * WC + w_bytes + 2 * 4 * WC
  vmem_limit = int(min(2 * block_bytes + (4 << 20), 64 << 20))

  return pl.pallas_call(
      _residual_block_kernel,
      out_shape=jax.ShapeDtypeStruct((B, H, WC), jnp.float32),
      grid_spec=pltpu.PrefetchScalarGridSpec(
          num_scalar_prefetch=0,
          grid=(B,),                      # batch-parallel: uses both v7x TCs
          in_specs=[
              pl.BlockSpec((1, H, WC), lambda b: (b, 0, 0)),
              pl.BlockSpec(M1f.shape, lambda b: (0, 0)),   # resident weights
              pl.BlockSpec((1, WC), lambda b: (0, 0)),
              pl.BlockSpec(M2f.shape, lambda b: (0, 0)),
              pl.BlockSpec((1, WC), lambda b: (0, 0)),
          ],
          out_specs=pl.BlockSpec((1, H, WC), lambda b: (b, 0, 0)),
      ),
      compiler_params=pltpu.CompilerParams(
          dimension_semantics=("parallel",),
          vmem_limit_bytes=vmem_limit),
      cost_estimate=cost,
  )(x_lane_dense, M1f, b1, M2f, b2)


def _reference(x, w1, cb1, g1, be1, rm1, rv1, w2, cb2, g2, be2, rm2, rv2,
               eps=1e-5):
  """Pure-JAX reference of the PyTorch forward (eval-mode BN), NCHW."""
  dn = jax.lax.conv_dimension_numbers(x.shape, w1.shape,
                                      ("NCHW", "OIHW", "NCHW"))

  def conv_bn(h, w, cb, g, be, mean, var):
    y = jax.lax.conv_general_dilated(h, w, (1, 1), ((1, 1), (1, 1)),
                                     dimension_numbers=dn)
    y = y + cb[None, :, None, None]
    scale = g / jnp.sqrt(var + eps)
    return ((y - mean[None, :, None, None]) * scale[None, :, None, None]
            + be[None, :, None, None])

  r = jax.nn.relu(conv_bn(x, w1, cb1, g1, be1, rm1, rv1))
  r = conv_bn(r, w2, cb2, g2, be2, rm2, rv2)
  return jax.nn.relu(x + r)


if __name__ == "__main__":
  B, C, H, W = 2, 8, 16, 16   # W * C = 128 -> lane-dense minor dim

  key = jax.random.PRNGKey(0)
  ks = jax.random.split(key, 13)
  x = jax.random.normal(ks[0], (B, C, H, W), jnp.float32)

  # Conv params (PyTorch OIHW) + BN affine params + non-trivial running stats.
  w1 = 0.1 * jax.random.normal(ks[1], (C, C, 3, 3), jnp.float32)
  cb1 = 0.1 * jax.random.normal(ks[2], (C,), jnp.float32)
  g1 = 1.0 + 0.1 * jax.random.normal(ks[3], (C,), jnp.float32)
  be1 = 0.1 * jax.random.normal(ks[4], (C,), jnp.float32)
  rm1 = 0.1 * jax.random.normal(ks[5], (C,), jnp.float32)
  rv1 = 0.5 + jax.random.uniform(ks[6], (C,), jnp.float32)

  w2 = 0.1 * jax.random.normal(ks[7], (C, C, 3, 3), jnp.float32)
  cb2 = 0.1 * jax.random.normal(ks[8], (C,), jnp.float32)
  g2 = 1.0 + 0.1 * jax.random.normal(ks[9], (C,), jnp.float32)
  be2 = 0.1 * jax.random.normal(ks[10], (C,), jnp.float32)
  rm2 = 0.1 * jax.random.normal(ks[11], (C,), jnp.float32)
  rv2 = 0.5 + jax.random.uniform(ks[12], (C,), jnp.float32)

  # --- One-time init (hoisted out of the forward): fold BN + band + fuse. ---
  params_f32 = fold_residual_block_params(
      w1, cb1, g1, be1, rm1, rv1, w2, cb2, g2, be2, rm2, rv2, W,
      matmul_dtype=jnp.float32)
  params_bf16 = fold_residual_block_params(   # v6e/v7x: halve weight DMA
      w1, cb1, g1, be1, rm1, rv1, w2, cb2, g2, be2, rm2, rv2, W,
      matmul_dtype=jnp.bfloat16)

  # One-time layout plumbing for the test harness only: the surrounding model
  # should keep the lane-dense (B, H, W*C) layout end-to-end so the forward
  # itself contains no NCHW<->NHWC transposes.
  x_ld = jnp.transpose(x, (0, 2, 3, 1)).reshape(B, H, W * C)

  ref = _reference(x, w1, cb1, g1, be1, rm1, rv1, w2, cb2, g2, be2, rm2, rv2)

  # f32 matmul path: tight correctness check against the reference.
  out_ld = jax.block_until_ready(residual_block_fwd(x_ld, *params_f32))
  out = jnp.transpose(out_ld.reshape(B, H, W, C), (0, 3, 1, 2))
  assert out.shape == (B, C, H, W)
  max_err = float(jnp.max(jnp.abs(out - ref)))
  assert jnp.allclose(out, ref, atol=2e-4, rtol=2e-4), max_err

  # bf16 matmul-operand path (v6e/v7x recommendation): accuracy/perf tradeoff,
  # checked with a loose relative-Frobenius tolerance.
  out_bf_ld = jax.block_until_ready(residual_block_fwd(x_ld, *params_bf16))
  out_bf = jnp.transpose(out_bf_ld.reshape(B, H, W, C), (0, 3, 1, 2))
  rel_err = float(jnp.linalg.norm(out_bf - ref) / jnp.linalg.norm(ref))
  assert rel_err < 3e-2, rel_err

  print("KERNEL_OK")
</pallas_src>

<mosaic_0001>
module attributes {stable_mosaic.version = 11 : i64} {
  func.func @_residual_block_kernel(%arg0: i32, %arg1: memref<1x16x128xf32, #tpu.memory_space<vmem>>, %arg2: memref<128x384xf32, #tpu.memory_space<vmem>>, %arg3: memref<1x128xf32, #tpu.memory_space<vmem>>, %arg4: memref<128x384xf32, #tpu.memory_space<vmem>>, %arg5: memref<1x128xf32, #tpu.memory_space<vmem>>, %arg6: memref<1x16x128xf32, #tpu.memory_space<vmem>>) attributes {dimension_semantics = [#tpu.dimension_semantics<parallel>], iteration_bounds = array<i64: 2>, scalar_prefetch = 0 : i64, scratch_operands = 0 : i64, tpu.core_type = #tpu.core_type<tc>, window_params = [{transform_indices = @transform_0, window_bounds = array<i64: 1, 16, 128>}, {pipeline_mode = #tpu.pipeline_mode<synchronous>, transform_indices = @transform_1, window_bounds = array<i64: 128, 384>}, {pipeline_mode = #tpu.pipeline_mode<synchronous>, transform_indices = @transform_2, window_bounds = array<i64: 1, 128>}, {pipeline_mode = #tpu.pipeline_mode<synchronous>, transform_indices = @transform_3, window_bounds = array<i64: 128, 384>}, {pipeline_mode = #tpu.pipeline_mode<synchronous>, transform_indices = @transform_4, window_bounds = array<i64: 1, 128>}, {transform_indices = @transform_5, window_bounds = array<i64: 1, 16, 128>}]} {
    %c0 = arith.constant 0 : index
    %c0_0 = arith.constant 0 : index
    %c0_1 = arith.constant 0 : index
    %0 = vector.load %arg1[%c0, %c0_0, %c0_1] : memref<1x16x128xf32, #tpu.memory_space<vmem>>, vector<1x16x128xf32>
    %1 = vector.shape_cast %0 : vector<1x16x128xf32> to vector<16x128xf32>
    %2 = tpu.iota {dimensions = array<i32: 0>} : vector<16x128xi32>
    %c0_i32 = arith.constant 0 : i32
    %3 = vector.broadcast %c0_i32 : i32 to vector<16x128xi32>
    %4 = arith.cmpi eq, %2, %3 : vector<16x128xi32>
    %c15_i32 = arith.constant 15 : i32
    %5 = vector.broadcast %c15_i32 : i32 to vector<16x128xi32>
    %6 = arith.cmpi eq, %2, %5 : vector<16x128xi32>
    %c0_2 = arith.constant 0 : index
    %c0_3 = arith.constant 0 : index
    %7 = vector.load %arg2[%c0_2, %c0_3] : memref<128x384xf32, #tpu.memory_space<vmem>>, vector<128x384xf32>
    %cst = arith.constant dense<0.000000e+00> : vector<16x384xf32>
    %8 = tpu.matmul %1, %7, %cst {dimension_numbers = #tpu.dot_dimension_numbers<[1], [0], [0], [1], [0, 0, 1, 1], [], []>} : vector<16x128xf32>, vector<128x384xf32>, vector<16x384xf32> -> vector<16x384xf32>
    %9 = vector.extract_strided_slice %8 {offsets = [0, 0], sizes = [16, 128], strides = [1, 1]} : vector<16x384xf32> to vector<16x128xf32>
    %10 = vector.extract_strided_slice %8 {offsets = [0, 128], sizes = [16, 128], strides = [1, 1]} : vector<16x384xf32> to vector<16x128xf32>
    %11 = vector.extract_strided_slice %8 {offsets = [0, 256], sizes = [16, 128], strides = [1, 1]} : vector<16x384xf32> to vector<16x128xf32>
    %c1_i32 = arith.constant 1 : i32
    %12 = tpu.dynamic_rotate %9 by %c1_i32 dim 0 : vector<16x128xf32>, i32 -> vector<16x128xf32>
    %cst_4 = arith.constant 0.000000e+00 : f32
    %13 = vector.broadcast %cst_4 : f32 to vector<16x128xf32>
    %14 = arith.select %4, %13, %12 : vector<16x128xi1>, vector<16x128xf32>
    %c15_i32_5 = arith.constant 15 : i32
    %15 = tpu.dynamic_rotate %11 by %c15_i32_5 dim 0 : vector<16x128xf32>, i32 -> vector<16x128xf32>
    %cst_6 = arith.constant 0.000000e+00 : f32
    %16 = vector.broadcast %cst_6 : f32 to vector<16x128xf32>
    %17 = arith.select %6, %16, %15 : vector<16x128xi1>, vector<16x128xf32>
    %18 = arith.addf %10, %14 : vector<16x128xf32>
    %19 = arith.addf %18, %17 : vector<16x128xf32>
    %c0_7 = arith.constant 0 : index
    %c0_8 = arith.constant 0 : index
    %20 = vector.load %arg3[%c0_7, %c0_8] : memref<1x128xf32, #tpu.memory_space<vmem>>, vector<1x128xf32>
    %21 = vector.broadcast %20 : vector<1x128xf32> to vector<16x128xf32>
    %22 = arith.addf %19, %21 : vector<16x128xf32>
    %cst_9 = arith.constant 0.000000e+00 : f32
    %23 = vector.broadcast %cst_9 : f32 to vector<16x128xf32>
    %24 = arith.maximumf %22, %23 : vector<16x128xf32>
    %c0_10 = arith.constant 0 : index
    %c0_11 = arith.constant 0 : index
    %25 = vector.load %arg4[%c0_10, %c0_11] : memref<128x384xf32, #tpu.memory_space<vmem>>, vector<128x384xf32>
    %cst_12 = arith.constant dense<0.000000e+00> : vector<16x384xf32>
    %26 = tpu.matmul %24, %25, %cst_12 {dimension_numbers = #tpu.dot_dimension_numbers<[1], [0], [0], [1], [0, 0, 1, 1], [], []>} : vector<16x128xf32>, vector<128x384xf32>, vector<16x384xf32> -> vector<16x384xf32>
    %27 = vector.extract_strided_slice %26 {offsets = [0, 0], sizes = [16, 128], strides = [1, 1]} : vector<16x384xf32> to vector<16x128xf32>
    %28 = vector.extract_strided_slice %26 {offsets = [0, 128], sizes = [16, 128], strides = [1, 1]} : vector<16x384xf32> to vector<16x128xf32>
    %29 = vector.extract_strided_slice %26 {offsets = [0, 256], sizes = [16, 128], strides = [1, 1]} : vector<16x384xf32> to vector<16x128xf32>
    %c1_i32_13 = arith.constant 1 : i32
    %30 = tpu.dynamic_rotate %27 by %c1_i32_13 dim 0 : vector<16x128xf32>, i32 -> vector<16x128xf32>
    %cst_14 = arith.constant 0.000000e+00 : f32
    %31 = vector.broadcast %cst_14 : f32 to vector<16x128xf32>
    %32 = arith.select %4, %31, %30 : vector<16x128xi1>, vector<16x128xf32>
    %c15_i32_15 = arith.constant 15 : i32
    %33 = tpu.dynamic_rotate %29 by %c15_i32_15 dim 0 : vector<16x128xf32>, i32 -> vector<16x128xf32>
    %cst_16 = arith.constant 0.000000e+00 : f32
    %34 = vector.broadcast %cst_16 : f32 to vector<16x128xf32>
    %35 = arith.select %6, %34, %33 : vector<16x128xi1>, vector<16x128xf32>
    %36 = arith.addf %28, %32 : vector<16x128xf32>
    %37 = arith.addf %36, %35 : vector<16x128xf32>
    %c0_17 = arith.constant 0 : index
    %c0_18 = arith.constant 0 : index
    %38 = vector.load %arg5[%c0_17, %c0_18] : memref<1x128xf32, #tpu.memory_space<vmem>>, vector<1x128xf32>
    %39 = vector.broadcast %38 : vector<1x128xf32> to vector<16x128xf32>
    %40 = arith.addf %37, %39 : vector<16x128xf32>
    %41 = arith.addf %1, %40 : vector<16x128xf32>
    %cst_19 = arith.constant 0.000000e+00 : f32
    %42 = vector.broadcast %cst_19 : f32 to vector<16x128xf32>
    %43 = arith.maximumf %41, %42 : vector<16x128xf32>
    %c0_20 = arith.constant 0 : index
    %c0_21 = arith.constant 0 : index
    %c0_22 = arith.constant 0 : index
    %44 = vector.load %arg6[%c0_20, %c0_21, %c0_22] : memref<1x16x128xf32, #tpu.memory_space<vmem>>, vector<1x16x128xf32>
    %45 = vector.shape_cast %44 : vector<1x16x128xf32> to vector<16x128xf32>
    %46 = vector.shape_cast %43 : vector<16x128xf32> to vector<1x16x128xf32>
    tpu.vector_store %arg6[%c0_20, %c0_21, %c0_22], %46 {strides = array<i32>} : memref<1x16x128xf32, #tpu.memory_space<vmem>>, vector<1x16x128xf32>,
    return
  }
  func.func @transform_0(%arg0: i32) -> (i32, i32, i32) {
    %c0_i32 = arith.constant 0 : i32
    %c0_i32_0 = arith.constant 0 : i32
    %c0_i32_1 = arith.constant 0 : i32
    return %arg0, %c0_i32, %c0_i32_0 : i32, i32, i32
  }
  func.func @transform_1(%arg0: i32) -> (i32, i32) {
    %c0_i32 = arith.constant 0 : i32
    %c0_i32_0 = arith.constant 0 : i32
    %c0_i32_1 = arith.constant 0 : i32
    return %c0_i32, %c0_i32_0 : i32, i32
  }
  func.func @transform_2(%arg0: i32) -> (i32, i32) {
    %c0_i32 = arith.constant 0 : i32
    %c0_i32_0 = arith.constant 0 : i32
    %c0_i32_1 = arith.constant 0 : i32
    return %c0_i32, %c0_i32_0 : i32, i32
  }
  func.func @transform_3(%arg0: i32) -> (i32, i32) {
    %c0_i32 = arith.constant 0 : i32
    %c0_i32_0 = arith.constant 0 : i32
    %c0_i32_1 = arith.constant 0 : i32
    return %c0_i32, %c0_i32_0 : i32, i32
  }
  func.func @transform_4(%arg0: i32) -> (i32, i32) {
    %c0_i32 = arith.constant 0 : i32
    %c0_i32_0 = arith.constant 0 : i32
    %c0_i32_1 = arith.constant 0 : i32
    return %c0_i32, %c0_i32_0 : i32, i32
  }
  func.func @transform_5(%arg0: i32) -> (i32, i32, i32) {
    %c0_i32 = arith.constant 0 : i32
    %c0_i32_0 = arith.constant 0 : i32
    %c0_i32_1 = arith.constant 0 : i32
    return %arg0, %c0_i32, %c0_i32_0 : i32, i32, i32
  }
}

</mosaic_0001>

<bundles_post_ra>
// kernel: residual_block_fwd.1
= control target key start
LH: loop header
LB: loop body
LE: loop exit
PB: predicated region body
PF: predicated region fallthrough
CT: control target
= control target key end

     0   :  { %10 = vsyncpa [#allocation3], 0  ;;  %s1468_s0 = inlined_call_operand.hbm [shape: f32[2,16,128], index: 0, kind: input, shape index: {}]   ;;  %s1469_s1 = inlined_call_operand.hbm [shape: f32[128,384], index: 1, kind: input, shape index: {}]   ;;  %s1470_s2 = inlined_call_operand.vmem [shape: f32[1,128], index: 2, kind: input, shape index: {}]   ;;  %s1471_s3 = inlined_call_operand.hbm [shape: f32[128,384], index: 3, kind: input, shape index: {}]   ;;  %s1472_s4 = inlined_call_operand.vmem [shape: f32[1,128], index: 4, kind: input, shape index: {}]   ;;  %s1473_s5 = inlined_call_operand.hbm [shape: f32[2,16,128], index: 5, kind: output, shape index: {}]  }
   0x1   :  { %12 = vsyncpa [#allocation3 + $0x1], 0 }
   0x2   :  { %13 = vsyncpa [#allocation6], 0 }
   0x3   :  { %14 = vsyncpa [#allocation4], 0 }
   0x4   :  { %16 = vsyncpa [#allocation4 + $0x1], 0  ;;  %s1240_s18 = smov 0   ;;  %s1242_s19 = smov 0  }
   0x5   :  { %s1244_s20 = smov 0   ;;  %s1246_s21 = smov 0  }
   0x6 LB: > { %s1261_s22 = sadd.s32 4294967295, %s1197_s21   ;;  %s847_s23 = sadd.s32 4294967294, %s1197_s21   ;;  %s1197_s21 = sphi %s1246_s21, %s1495_s21   ;;  %s1193_s20 = sphi %s1244_s20, %s1494_s20   ;;  %s1189_s19 = sphi %s1242_s19, %s1493_s19   ;;  %s1185_s18 = sphi %s1240_s18, %s1492_s18  }
   0x7   : > { %p42_p0 = scmp.ne.s32.totalorder %s1189_s19, %s1185_s18  ;;  %p1474_p1 = scmp.eq.s32.totalorder %s1261_s22, 0 }
   0x8   : > { %p156_p3 = scmp.eq.s32.totalorder %s847_s23, 1  ;;  %p848_p5 = scmp.ge.s32.totalorder %s1197_s21, 1 }
   0x9   : > { %p1270_p4 = por %p1474_p1, %p42_p0  ;;  %p163_p7 = scmp.lt.s32.totalorder %s1197_s21, 3 }
   0xa   : > { %p1275_p6 = por %p156_p3, %p42_p0  ;;  %s1199_s27 = smov [#allocation5]  }
   0xb   : > { %s1478_s24 = scalar_select %p1270_p4, 1, 0 }
   0xc   : > { %s1479_s25 = scalar_select %p1275_p6, 1, 0 }
   0xd   : > { %p1280_p8 = pnand %p848_p5, %p163_p7  ;;  %s175_s28 = sshll.u32 %s1199_s27, 4  ;;  %s176_s28 = int_to_ptr.vmem [resolvable:$true] %s175_s28 }
   0xe   : > { %s1200_s30 = smov [#allocation7]   ;;  %s1060_s7 = scalar_lea.vmem %s176_s28, 6144 }
   0xf   : > { %s1480_s26 = scalar_select %p1280_p8, 1, 0 }
  0x10   : > { %p987_p9 = pneg %p1280_p8  ;;  %s191_s6 = sshll.u32 %s1200_s30, 4  ;;  %s192_s6 = int_to_ptr.vmem [resolvable:$true] %s191_s6 }
  0x11   : > { %p1061_p13 = scmp.ne.s32.totalorder %s176_s28, %s1060_s7  ;;  %p1068_p5 = scmp.lt.s32.totalorder %s176_s28, %s176_s28 }
  0x12   : > { %p1289_p11 = pnand %p987_p9, %p1474_p1  ;;  %p1069_p7 = scmp.lt.s32.totalorder %s1060_s7, %s1060_s7 }
  0x14   : > { %p1051_p12 = pneg %p1289_p11  ;;  %p1070_p10 = por %p1069_p7, %p1068_p5 }
  0x16   : > { %p1063_p0 = pnand %p1061_p13, %p1051_p12 }
  0x18   : > { %p1064_p3 = pneg %p1063_p0 }
  0x1a   : > { %p1071_p9 = pnand %p1070_p10, %p1064_p3 }
  0x1c   : > { %1074 = shalt.err (!%p1071_p9)
}
  0x1d   : > { %s1201_s8 = smov 384   ;;  %s1202_s9 = smov 24  }
  0x1e   : > { %990 = dma.hbm_to_vmem [thread:$0]  (!%p1289_p11), %s1469_s1, 6144, %s176_s28, [#allocation6], %s1201_s8, %s1201_s8, %s1202_s9  }
  0x1f   : > { %s1086_s12 = scalar_lea.vmem %s192_s6, 6144  ;;  %p1094_p2 = scmp.lt.s32.totalorder %s192_s6, %s192_s6 }
  0x20   : > { %p1087_p1 = scmp.ne.s32.totalorder %s192_s6, %s1086_s12  ;;  %p1095_p6 = scmp.lt.s32.totalorder %s1086_s12, %s1086_s12 }
  0x22   : > { %p1089_p13 = pnand %p1087_p1, %p1051_p12  ;;  %p1096_p5 = por %p1095_p6, %p1094_p2 }
  0x24   : > { %p1090_p0 = pneg %p1089_p13 }
  0x26   : > { %p1097_p10 = pnand %p1096_p5, %p1090_p0 }
  0x28   : > { %1100 = shalt.err (!%p1097_p10)
}
  0x29   : > { %993 = dma.hbm_to_vmem [thread:$0]  (!%p1289_p11), %s1471_s3, 6144, %s192_s6, [#allocation6], %s1201_s8, %s1201_s8, %s1202_s9  }
  0x2a   : > { %s1312_s15 = sadd.s32 1, %s1197_s21   ;;  %s29_s16 = sadd.s32 1, %s1193_s20 }
  0x2b   : > { %s26_s17 = ssub.s32 %s1197_s21, %s1312_s15  ;;  %p36_p1 = scmp.ne.s32.totalorder %s1193_s20, %s1189_s19 }
  0x2c   : > { %p27_p2 = scmp.eq.s32.totalorder %s26_s17, 0  ;;  %p37_p6 = scmp.eq.s32.totalorder %s1197_s21, 0 }
  0x2d   : > { %p1482_p12 = scmp.eq.s32.totalorder %s1261_s22, 1  ;;  %p1004_p7 = scmp.lt.s32.totalorder %s1197_s21, 2 }
  0x2e   : > { %s1328_s27 = scalar_select %p27_p2, %s1193_s20, %s29_s16  }
  0x2f   : > { %p1322_p3 = por %p1482_p12, %p36_p1  ;;  %p38_p9 = por %p37_p6, %p36_p1 }
  0x30   : > { %s208_s28 = sand.u32 1, %s1193_s20   ;;  %s867_s30 = sshll.u32 %s1197_s21, 8 }
  0x31   : > { %s1483_s23 = scalar_select %p1322_p3, 1, 0 }
  0x32   : > { %s852_s29 = sshll.u32 %s208_s28, 4  ;;  %s1335_s8 = scalar_lea.hbm %s1468_s0, %s867_s30 }
  0x33   : > { %s212_s9 = scalar_lea.vmem [#allocation2], %s852_s29  ;;  %p1339_p11 = pnand %p1004_p7, %p38_p9 }
  0x34   : > { %s219_s10 = sshll.u32 %s212_s9, 4  ;;  %s1343_s12 = scalar_lea.sflag [#allocation3], %s208_s28  ;;  %s1337_s10 = int_to_ptr.vmem [resolvable:$true] %s219_s10 }
  0x35   : > { %s1101_s13 = scalar_lea.hbm %s1335_s8, 256  ;;  %p1103_p0 = pneg %p1339_p11 }
  0x36   : > { %p1102_p13 = scmp.ne.s32.totalorder %s1335_s8, %s1101_s13  ;;  %s1106_s17 = scalar_lea.hbm %s1468_s0, 512 }
  0x37   : > { %p1107_p1 = scmp.lt.s32.totalorder %s1335_s8, %s1468_s0  ;;  %p1108_p2 = scmp.lt.s32.totalorder %s1106_s17, %s1101_s13 }
  0x38   : > { %p1104_p5 = pnand %p1103_p0, %p1102_p13 }
  0x39   : > { %p1109_p6 = por %p1108_p2, %p1107_p1 }
  0x3a   : > { %p1105_p10 = pneg %p1104_p5 }
  0x3c   : > { %p1110_p12 = pnand %p1109_p6, %p1105_p10 }
  0x3e   : > { %1113 = shalt.err (!%p1110_p12)
}
  0x3f   : > { %s1114_s28 = scalar_lea.vmem %s1337_s10, 256  ;;  %s1203_s6 = smov [#allocation2]  }
  0x40   : > { %p1115_p7 = scmp.ne.s32.totalorder %s1337_s10, %s1114_s28  ;;  %s1119_s7 = sshll.u32 %s1203_s6, 4  ;;  %s1120_s7 = int_to_ptr.vmem [resolvable:$false] %s1119_s7 }
  0x41   : > { %s1121_s9 = scalar_lea.vmem %s1120_s7, 512  ;;  %p1122_p5 = scmp.lt.s32.totalorder %s1337_s10, %s1120_s7 }
  0x42   : > { %p1117_p9 = pnand %p1115_p7, %p1103_p0  ;;  %p1123_p3 = scmp.lt.s32.totalorder %s1121_s9, %s1114_s28 }
  0x44   : > { %p1118_p13 = pneg %p1117_p9  ;;  %p1124_p4 = por %p1123_p3, %p1122_p5 }
  0x46   : > { %p1125_p8 = pnand %p1124_p4, %p1118_p13 }
  0x48   : > { %1128 = shalt.err (!%p1125_p8)
}
  0x49   : > { %s1204_s13 = smov 128   ;;  %s1205_s14 = smov 8  }
  0x4a   : > { %997 = dma.hbm_to_vmem [thread:$0]  (!%p1339_p11), %s1335_s8, 256, %s1337_s10, %s1343_s12, %s1204_s13, %s1204_s13, %s1205_s14  }
  0x4b   : > { %p1485_p0 = scmp.ne.s32.totalorder %s1480_s26, 0 }
  0x4c   : > { %s1367_s16 = sand.u32 (!%p1485_p0), 1, %s1189_s19   ;;  %p1486_p4 = scmp.ne.s32.totalorder (!%p1485_p0), %s1478_s24, 0 }
  0x4d   : > { %231 = sbr.rel (%p1485_p0) target bundleno = 553 (0x229), region = 40  ;;  %s856_s17 = sshll.u32 (!%p1485_p0), %s1367_s16, 4 }
  0x4e   : > { %s234_s29 = scalar_lea.sflag (!%p1485_p0), [#allocation3], %s1367_s16  ;;  %s1373_s30 = scalar_lea.vmem (!%p1485_p0), [#allocation2], %s856_s17 }
  0x52   : > { %1172 = dma.done.wait (%p1486_p4), %s234_s29, 256  }
  0x53   : > { %1174 = vsyncadd (%p1486_p4), %s234_s29, 4294967040  ;;  %p1487_p8 = scmp.eq.s32.totalorder %s1261_s22, 0 }
  0x55   : > { %1176 = dma.done.wait (%p1487_p8), [#allocation6], 12288   ;;  %p1488_p3 = pmov %p1487_p8 }
  0x56   : > { %v1206_v0 = vmov 0.0   ;;  %v327_v1 = vld [vmem:[#allocation5 + $0x170] sm:$0xff]  ;;  %v326_v2 = vld [vmem:[#allocation5 + $0x168] sm:$0xff]  ;;  %v324_v3 = vld [vmem:[#allocation5 + $0x158] sm:$0xff]  ;;  %s868_s11 = sshll.u32 %s1261_s22, 8  ;;  %s271_s12 = scalar_lea.vmem [#allocation8], %s856_s17 }
  0x57   : > { %1178 = vsyncadd (%p1488_p3), [#allocation6], 4294955008  ;;  %393 = vmatprep.mubr.f32.mxu0 %v1206_v0  ;;  %329 = vmatprep.subr.mxu0 %v327_v1  ;;  %v323_v4 = vld [vmem:[#allocation5 + $0x150] sm:$0xff]  ;;  %v328_v5 = vld [vmem:[#allocation5 + $0x178] sm:$0xff]  ;;  %s755_s28 = sshll.u32 %s271_s12, 4  ;;  %s1423_s9 = scalar_lea.hbm %s1473_s5, %s868_s11  ;;  %s1425_s28 = int_to_ptr.vmem [resolvable:$true] %s755_s28 }
  0x58   : > { %330 = vmatpush1.msra.mxu0 %v326_v2  ;;  %905 = vmatprep.subr.mxu1 %v328_v5  ;;  %v321_v6 = vld [vmem:[#allocation5 + $0x140] sm:$0xff]  ;;  %v320_v8 = vld [vmem:[#allocation5 + $0x138] sm:$0xff]  ;;  %v322_v9 = vld [vmem:[#allocation5 + $0x148] sm:$0xff]  ;;  %s742_s22 = scalar_lea.sflag [#allocation4], %s1367_s16  ;;  %s1129_s13 = scalar_lea.vmem %s1425_s28, 256 }
  0x59   : > { %v325_v7 = vld [vmem:[#allocation5 + $0x160] sm:$0xff]  ;;  %331 = vmatprep.subr.mxu0 %v324_v3  ;;  %906 = vmatpush3.msra.mxu1 %v328_v5  ;;  %v318_v10 = vld [vmem:[#allocation5 + $0x128] sm:$0xff]  ;;  %v319_v12 = vld [vmem:[#allocation5 + $0x130] sm:$0xff]  ;;  %p1130_p11 = scmp.ne.s32.totalorder %s1425_s28, %s1129_s13  ;;  %p1489_p10 = scmp.ne.s32.totalorder %s1483_s23, 0 }
  0x5a   : > { %332 = vmatpush1.msra.mxu0 %v323_v4  ;;  %907 = vmatprep.subr.mxu1 %v325_v7  ;;  %v317_v11 = vld [vmem:[#allocation5 + $0x120] sm:$0xff]  ;;  %v315_v13 = vld [vmem:[#allocation5 + $0x110] sm:$0xff]  ;;  %v314_v14 = vld [vmem:[#allocation5 + $0x108] sm:$0xff]  ;;  %s1207_s14 = smov [#allocation8]  }
  0x5b   : > { %333 = vmatprep.subr.mxu0 %v321_v6  ;;  %908 = vmatpush3.msra.mxu1 %v325_v7  ;;  %v316_v15 = vld [vmem:[#allocation5 + $0x118] sm:$0xff]  ;;  %v311_v17 = vld [vmem:[#allocation5 + $0xf0] sm:$0xff]  ;;  %v313_v18 = vld [vmem:[#allocation5 + $0x100] sm:$0xff]  ;;  %p1131_p1 = pnand %p1130_p11, %p1489_p10  ;;  %s1133_s17 = sshll.u32 %s1207_s14, 4  ;;  %s1134_s17 = int_to_ptr.vmem [resolvable:$false] %s1133_s17 }
  0x5c   : > { %334 = vmatpush1.msra.mxu0 %v320_v8  ;;  %909 = vmatprep.subr.mxu1 %v322_v9  ;;  %v312_v16 = vld [vmem:[#allocation5 + $0xf8] sm:$0xff]  ;;  %v309_v19 = vld [vmem:[#allocation5 + $0xe0] sm:$0xff]  ;;  %v310_v21 = vld [vmem:[#allocation5 + $0xe8] sm:$0xff]  ;;  %s1135_s29 = scalar_lea.vmem %s1134_s17, 512  ;;  %p1136_p6 = scmp.lt.s32.totalorder %s1425_s28, %s1134_s17 }
  0x5d   : > { %335 = vmatprep.subr.mxu0 %v318_v10  ;;  %910 = vmatpush3.msra.mxu1 %v322_v9  ;;  %v308_v20 = vld [vmem:[#allocation5 + $0xd8] sm:$0xff]  ;;  %v306_v22 = vld [vmem:[#allocation5 + $0xc8] sm:$0xff]  ;;  %v305_v23 = vld [vmem:[#allocation5 + $0xc0] sm:$0xff]  ;;  %p1132_p2 = pneg %p1131_p1  ;;  %p1137_p12 = scmp.lt.s32.totalorder %s1135_s29, %s1129_s13 }
  0x5e   : > { %336 = vmatpush1.msra.mxu0 %v317_v11  ;;  %911 = vmatprep.subr.mxu1 %v319_v12  ;;  %v307_v24 = vld [vmem:[#allocation5 + $0xd0] sm:$0xff]  ;;  %v302_v26 = vld [vmem:[#allocation5 + $0xa8] sm:$0xff]  ;;  %v304_v27 = vld [vmem:[#allocation5 + $0xb8] sm:$0xff] }
  0x5f   : > { %337 = vmatprep.subr.mxu0 %v315_v13  ;;  %912 = vmatpush3.msra.mxu1 %v319_v12  ;;  %v303_v25 = vld [vmem:[#allocation5 + $0xb0] sm:$0xff]  ;;  %v300_v28 = vld [vmem:[#allocation5 + $0x98] sm:$0xff]  ;;  %v301_v30 = vld [vmem:[#allocation5 + $0xa0] sm:$0xff]  ;;  %p1138_p7 = por %p1137_p12, %p1136_p6 }
  0x60   : > { %338 = vmatpush1.msra.mxu0 %v314_v14  ;;  %913 = vmatprep.subr.mxu1 %v316_v15  ;;  %v299_v29 = vld [vmem:[#allocation5 + $0x90] sm:$0xff]  ;;  %v297_v31 = vld [vmem:[#allocation5 + $0x80] sm:$0xff]  ;;  %v296_v32 = vld [vmem:[#allocation5 + $0x78] sm:$0xff] }
  0x61   : > { %339 = vmatprep.subr.mxu0 %v312_v16  ;;  %914 = vmatpush3.msra.mxu1 %v316_v15  ;;  %v298_v33 = vld [vmem:[#allocation5 + $0x88] sm:$0xff]  ;;  %v293_v35 = vld [vmem:[#allocation5 + $0x60] sm:$0xff]  ;;  %v295_v36 = vld [vmem:[#allocation5 + $0x70] sm:$0xff]  ;;  %p1139_p9 = pnand %p1138_p7, %p1132_p2 }
  0x62   : > { %340 = vmatpush1.msra.mxu0 %v311_v17  ;;  %915 = vmatprep.subr.mxu1 %v313_v18  ;;  %v294_v34 = vld [vmem:[#allocation5 + $0x68] sm:$0xff]  ;;  %v291_v37 = vld [vmem:[#allocation5 + $0x50] sm:$0xff]  ;;  %v292_v39 = vld [vmem:[#allocation5 + $0x58] sm:$0xff] }
  0x63   : > { %341 = vmatprep.subr.mxu0 %v309_v19  ;;  %916 = vmatpush3.msra.mxu1 %v313_v18  ;;  %v290_v38 = vld [vmem:[#allocation5 + $0x48] sm:$0xff]  ;;  %v288_v40 = vld [vmem:[#allocation5 + $0x38] sm:$0xff]  ;;  %v287_v41 = vld [vmem:[#allocation5 + $0x30] sm:$0xff] }
  0x64   : > { %342 = vmatpush1.msra.mxu0 %v308_v20  ;;  %917 = vmatprep.subr.mxu1 %v310_v21  ;;  %v289_v42 = vld [vmem:[#allocation5 + $0x40] sm:$0xff]  ;;  %v284_v44 = vld [vmem:[#allocation5 + $0x18] sm:$0xff]  ;;  %v286_v45 = vld [vmem:[#allocation5 + $0x28] sm:$0xff] }
  0x65   : > { %343 = vmatprep.subr.mxu0 %v306_v22  ;;  %918 = vmatpush3.msra.mxu1 %v310_v21  ;;  %v285_v43 = vld [vmem:[#allocation5 + $0x20] sm:$0xff]  ;;  %v282_v46 = vld [vmem:[#allocation5 + $0x8] sm:$0xff]  ;;  %v283_v48 = vld [vmem:[#allocation5 + $0x10] sm:$0xff] }
  0x66   : > { %344 = vmatpush1.msra.mxu0 %v305_v23  ;;  %919 = vmatprep.subr.mxu1 %v307_v24  ;;  %v281_v47 = vld [vmem:[#allocation5] sm:$0xff]  ;;  %v1388_v50 = vld [vmem:[%s1373_s30 + $0x8] sm:$0xff]  ;;  %v556_v51 = vld [vmem:[#allocation7 + $0x170] sm:$0xff] }
  0x67   : > { %345 = vmatprep.subr.mxu0 %v303_v25  ;;  %920 = vmatpush3.msra.mxu1 %v307_v24  ;;  %v1385_v49 = vld [vmem:[%s1373_s30] sm:$0xff]  ;;  %v555_v52 = vld [vmem:[#allocation7 + $0x168] sm:$0xff]  ;;  %v557_v53 = vld [vmem:[#allocation7 + $0x178] sm:$0xff] }
  0x68   : > { %346 = vmatpush1.msra.mxu0 %v302_v26  ;;  %921 = vmatprep.subr.mxu1 %v304_v27  ;;  %v553_v54 = vld [vmem:[#allocation7 + $0x158] sm:$0xff]  ;;  %v552_v55 = vld [vmem:[#allocation7 + $0x150] sm:$0xff]  ;;  %v554_v56 = vld [vmem:[#allocation7 + $0x160] sm:$0xff] }
  0x69   : > { %347 = vmatprep.subr.mxu0 %v300_v28  ;;  %922 = vmatpush3.msra.mxu1 %v304_v27  ;;  %v550_v57 = vld [vmem:[#allocation7 + $0x140] sm:$0xff]  ;;  %v549_v58 = vld [vmem:[#allocation7 + $0x138] sm:$0xff]  ;;  %v551_v59 = vld [vmem:[#allocation7 + $0x148] sm:$0xff] }
  0x6a   : > { %348 = vmatpush1.msra.mxu0 %v299_v29  ;;  %923 = vmatprep.subr.mxu1 %v301_v30  ;;  %v547_v60 = vld [vmem:[#allocation7 + $0x128] sm:$0xff]  ;;  %v546_v61 = vld [vmem:[#allocation7 + $0x120] sm:$0xff]  ;;  %v548_v62 = vld [vmem:[#allocation7 + $0x130] sm:$0xff] }
  0x6b   : > { %349 = vmatprep.subr.mxu0 %v297_v31  ;;  %924 = vmatpush3.msra.mxu1 %v301_v30  ;;  %v544_v63 = vld [vmem:[#allocation7 + $0x110] sm:$0xff]  ;;  %v543_v1 = vld [vmem:[#allocation7 + $0x108] sm:$0xff]  ;;  %v545_v2 = vld [vmem:[#allocation7 + $0x118] sm:$0xff] }
  0x6c   : > { %350 = vmatpush1.msra.mxu0 %v296_v32  ;;  %925 = vmatprep.subr.mxu1 %v298_v33  ;;  %v541_v3 = vld [vmem:[#allocation7 + $0xf8] sm:$0xff]  ;;  %v540_v4 = vld [vmem:[#allocation7 + $0xf0] sm:$0xff]  ;;  %v542_v5 = vld [vmem:[#allocation7 + $0x100] sm:$0xff] }
  0x6d   : > { %351 = vmatprep.subr.mxu0 %v294_v34  ;;  %926 = vmatpush3.msra.mxu1 %v298_v33  ;;  %v538_v6 = vld [vmem:[#allocation7 + $0xe0] sm:$0xff]  ;;  %v537_v7 = vld [vmem:[#allocation7 + $0xd8] sm:$0xff]  ;;  %v539_v8 = vld [vmem:[#allocation7 + $0xe8] sm:$0xff] }
  0x6e   : > { %352 = vmatpush1.msra.mxu0 %v293_v35  ;;  %927 = vmatprep.subr.mxu1 %v295_v36  ;;  %v535_v9 = vld [vmem:[#allocation7 + $0xc8] sm:$0xff]  ;;  %v534_v10 = vld [vmem:[#allocation7 + $0xc0] sm:$0xff]  ;;  %v536_v11 = vld [vmem:[#allocation7 + $0xd0] sm:$0xff] }
  0x6f   : > { %353 = vmatprep.subr.mxu0 %v291_v37  ;;  %928 = vmatpush3.msra.mxu1 %v295_v36  ;;  %v532_v12 = vld [vmem:[#allocation7 + $0xb0] sm:$0xff]  ;;  %v531_v13 = vld [vmem:[#allocation7 + $0xa8] sm:$0xff]  ;;  %v533_v14 = vld [vmem:[#allocation7 + $0xb8] sm:$0xff]  ;;  %v274_v36 = vlaneseq }
  0x70   : > { %354 = vmatpush1.msra.mxu0 %v290_v38  ;;  %929 = vmatprep.subr.mxu1 %v292_v39  ;;  %v529_v15 = vld [vmem:[#allocation7 + $0x98] sm:$0xff]  ;;  %v528_v16 = vld [vmem:[#allocation7 + $0x90] sm:$0xff]  ;;  %v530_v17 = vld [vmem:[#allocation7 + $0xa0] sm:$0xff] }
  0x71   : > { %355 = vmatprep.subr.mxu0 %v288_v40  ;;  %930 = vmatpush3.msra.mxu1 %v292_v39  ;;  %v526_v18 = vld [vmem:[#allocation7 + $0x80] sm:$0xff]  ;;  %v525_v19 = vld [vmem:[#allocation7 + $0x78] sm:$0xff]  ;;  %v527_v20 = vld [vmem:[#allocation7 + $0x88] sm:$0xff]  ;;  %v275_v37 = vshrl.u32 %v274_v36, 7 }
  0x72   : > { %356 = vmatpush1.msra.mxu0 %v287_v41  ;;  %931 = vmatprep.subr.mxu1 %v289_v42  ;;  %v523_v21 = vld [vmem:[#allocation7 + $0x68] sm:$0xff]  ;;  %v522_v22 = vld [vmem:[#allocation7 + $0x60] sm:$0xff]  ;;  %v524_v23 = vld [vmem:[#allocation7 + $0x70] sm:$0xff] }
  0x73   : > { %357 = vmatprep.subr.mxu0 %v285_v43  ;;  %932 = vmatpush3.msra.mxu1 %v289_v42  ;;  %v520_v24 = vld [vmem:[#allocation7 + $0x50] sm:$0xff]  ;;  %v519_v25 = vld [vmem:[#allocation7 + $0x48] sm:$0xff]  ;;  %v521_v26 = vld [vmem:[#allocation7 + $0x58] sm:$0xff]  ;;  %v276_v39 = vadd.s32 8, %v275_v37  ;;  %vm277_vm0 = vcmp.eq.s32.totalorder %v275_v37, 0  ;;  %vm483_vm1 = vcmp.lt.s32.totalorder %v275_v37, 1 }
  0x74   : > { %358 = vmatpush1.msra.mxu0 %v284_v44  ;;  %933 = vmatprep.subr.mxu1 %v286_v45  ;;  %v517_v27 = vld [vmem:[#allocation7 + $0x38] sm:$0xff]  ;;  %v516_v28 = vld [vmem:[#allocation7 + $0x30] sm:$0xff]  ;;  %v518_v29 = vld [vmem:[#allocation7 + $0x40] sm:$0xff]  ;;  %vm490_vm2 = vcmp.lt.s32.totalorder %v275_v37, 7 }
  0x75   : > { %359 = vmatprep.subr.mxu0 %v282_v46  ;;  %934 = vmatpush3.msra.mxu1 %v286_v45  ;;  %v514_v30 = vld [vmem:[#allocation7 + $0x20] sm:$0xff]  ;;  %v513_v31 = vld [vmem:[#allocation7 + $0x18] sm:$0xff]  ;;  %v515_v32 = vld [vmem:[#allocation7 + $0x28] sm:$0xff]  ;;  %vm280_vm3 = vcmp.eq.s32.totalorder %v276_v39, 15 }
  0x76   : > { %360 = vmatpush1.msra.mxu0 %v281_v47  ;;  %935 = vmatprep.subr.mxu1 %v283_v48  ;;  %v511_v33 = vld [vmem:[#allocation7 + $0x8] sm:$0xff]  ;;  %v510_v34 = vld [vmem:[#allocation7] sm:$0xff]  ;;  %v512_v35 = vld [vmem:[#allocation7 + $0x10] sm:$0xff] }
  0x77   : > { %394 = vmatmul.mubr.f32.vlgmr.msra.gmra.mxu0 %v1385_v49  ;;  %936 = vmatpush3.msra.mxu1 %v283_v48 }
  0x78   : > { %937 = vmatprep.mubr.f32.mxu1 %v1385_v49  ;;  %399 = vmatprep.mubr.f32.mxu0 %v1206_v0 }
  0x79   : > { %938 = vmatmul.mubr.f32.vlgmr.msra.gmra.mxu1 %v1388_v50  ;;  %558 = vmatprep.subr.mxu0 %v556_v51 }
  0x7a   : > { %559 = vmatpush1.msra.mxu0 %v555_v52  ;;  %940 = vmatprep.subr.mxu1 %v557_v53 }
  0x7b   : > { %400 = vmatmul.mubr.f32.gmra.mxu0 %v1388_v50  ;;  %560 = vmatprep.subr.mxu0 %v553_v54 }
  0x7c   : > { %941 = vmatpush3.msra.mxu1 %v557_v53  ;;  %561 = vmatpush1.msra.mxu0 %v552_v55 }
  0x7d   : > { %942 = vmatprep.subr.mxu1 %v554_v56  ;;  %562 = vmatprep.subr.mxu0 %v550_v57 }
  0x7e   : > { %943 = vmatpush3.msra.mxu1 %v554_v56  ;;  %563 = vmatpush1.msra.mxu0 %v549_v58  ;;  %v860_v58 = vld [vmem:[%s1470_s2] ss:$0 sm:$0xff] }
  0x7f   : > { %944 = vmatprep.subr.mxu1 %v551_v59  ;;  %564 = vmatprep.subr.mxu0 %v547_v60 }
  0x80   : > { %945 = vmatpush3.msra.mxu1 %v551_v59  ;;  %565 = vmatpush1.msra.mxu0 %v546_v61 }
  0x81   : > { %946 = vmatprep.subr.mxu1 %v548_v62  ;;  %566 = vmatprep.subr.mxu0 %v544_v63 }
  0x82   : > { %947 = vmatpush3.msra.mxu1 %v548_v62  ;;  %567 = vmatpush1.msra.mxu0 %v543_v1 }
  0x83   : > { %948 = vmatprep.subr.mxu1 %v545_v2  ;;  %568 = vmatprep.subr.mxu0 %v541_v3 }
  0x84   : > { %949 = vmatpush3.msra.mxu1 %v545_v2  ;;  %569 = vmatpush1.msra.mxu0 %v540_v4 }
  0x85   : > { %950 = vmatprep.subr.mxu1 %v542_v5  ;;  %570 = vmatprep.subr.mxu0 %v538_v6 }
  0x86   : > { %951 = vmatpush3.msra.mxu1 %v542_v5  ;;  %571 = vmatpush1.msra.mxu0 %v537_v7 }
  0x87   : > { %952 = vmatprep.subr.mxu1 %v539_v8  ;;  %572 = vmatprep.subr.mxu0 %v535_v9 }
  0x88   : > { %953 = vmatpush3.msra.mxu1 %v539_v8  ;;  %622 = vmatprep.mubr.f32.mxu0 %v1206_v0 }
  0x89   : > { %573 = vmatpush1.msra.mxu0 %v534_v10  ;;  %954 = vmatprep.subr.mxu1 %v536_v11 }
  0x8a   : > { %574 = vmatprep.subr.mxu0 %v532_v12  ;;  %955 = vmatpush3.msra.mxu1 %v536_v11 }
  0x8b   : > { %575 = vmatpush1.msra.mxu0 %v531_v13  ;;  %956 = vmatprep.subr.mxu1 %v533_v14 }
  0x8c   : > { %576 = vmatprep.subr.mxu0 %v529_v15  ;;  %957 = vmatpush3.msra.mxu1 %v533_v14 }
  0x8d   : > { %577 = vmatpush1.msra.mxu0 %v528_v16  ;;  %958 = vmatprep.subr.mxu1 %v530_v17 }
  0x8e   : > { %578 = vmatprep.subr.mxu0 %v526_v18  ;;  %959 = vmatpush3.msra.mxu1 %v530_v17 }
  0x8f   : > { %579 = vmatpush1.msra.mxu0 %v525_v19  ;;  %960 = vmatprep.subr.mxu1 %v527_v20  ;;  %v861_v19 = vld [vmem:[%s1472_s4] ss:$0 sm:$0xff] }
  0x90   : > { %580 = vmatprep.subr.mxu0 %v523_v21  ;;  %961 = vmatpush3.msra.mxu1 %v527_v20 }
  0x91   : > { %581 = vmatpush1.msra.mxu0 %v522_v22  ;;  %962 = vmatprep.subr.mxu1 %v524_v23 }
  0x92   : > { %582 = vmatprep.subr.mxu0 %v520_v24  ;;  %963 = vmatpush3.msra.mxu1 %v524_v23 }
  0x93   : > { %583 = vmatpush1.msra.mxu0 %v519_v25  ;;  %964 = vmatprep.subr.mxu1 %v521_v26 }
  0x94   : > { %584 = vmatprep.subr.mxu0 %v517_v27  ;;  %965 = vmatpush3.msra.mxu1 %v521_v26 }
  0x95   : > { %585 = vmatpush1.msra.mxu0 %v516_v28  ;;  %966 = vmatprep.subr.mxu1 %v518_v29 }
  0x96   : > { %586 = vmatprep.subr.mxu0 %v514_v30  ;;  %967 = vmatpush3.msra.mxu1 %v518_v29 }
  0x97   : > { %587 = vmatpush1.msra.mxu0 %v513_v31  ;;  %968 = vmatprep.subr.mxu1 %v515_v32 }
  0x98   : > { %588 = vmatprep.subr.mxu0 %v511_v33  ;;  %969 = vmatpush3.msra.mxu1 %v515_v32 }
  0x99   : > { %589 = vmatpush1.msra.mxu0 %v510_v34  ;;  %970 = vmatprep.subr.mxu1 %v512_v35 }
  0x9a   : > { %971 = vmatpush3.msra.mxu1 %v512_v35 }
 0x137   : > { %v395_v38 = vpop.f32.mrf.mxu0 }
 0x138   : > { %v481_v45 = vrot.slane %v395_v38, 7 }
 0x139   : > { %v397_v40 = vpop.f32.mrf.mxu0  ;;  %v939_v41 = vpop.f32.mrf.mxu1 }
 0x13a   : > { %v489_v42 = vrot.slane %v939_v41, 1 }
 0x13b   : > { %v401_v43 = vpop.f32.mrf.mxu0  ;;  %v472_v44 = vpop.f32.mrf.mxu1 }
 0x13c   : > { %v482_v46 = vrot.slane %v401_v43, 7  ;;  %v488_v47 = vrot.slane %v472_v44, 1 }
 0x13d   : > { %v403_v48 = vpop.f32.mrf.mxu0 }
 0x13e   : > { %v485_v51 = vsel %vm483_vm1, %v482_v46, %v481_v45  ;;  %v484_v52 = vsel %vm483_vm1, %v481_v45, %v482_v46  ;;  %v492_v53 = vsel %vm490_vm2, %v489_v42, %v488_v47  ;;  %v491_v59 = vsel %vm490_vm2, %v488_v47, %v489_v42 }
 0x13f   : > { %v486_v54 = vsel %vm277_vm0, 0.0, %v485_v51  ;;  %v494_v55 = vsel %vm280_vm3, 0.0, %v492_v53  ;;  %v496_v56 = vadd.f32 %v484_v52, %v403_v48 }
 0x140   : > { %v495_v57 = vadd.f32 %v486_v54, %v397_v40 }
 0x141   : > { %v498_v60 = vadd.f32 %v496_v56, %v494_v55 }
 0x142   : > { %v497_v61 = vadd.f32 %v495_v57, %v491_v59 }
 0x143   : > { %v507_v62 = vadd.f32 %v860_v58, %v498_v60 }
 0x144   : > { %v506_v63 = vadd.f32 %v860_v58, %v497_v61 }
 0x145   : > { %v509_v2 = vmax.f32 %v507_v62, 0.0 }
 0x146   : > { %v508_v1 = vmax.f32 %v506_v63, 0.0 }
 0x148   : > { %623 = vmatmul.mubr.f32.vlgmr.msra.gmra.mxu0 %v508_v1  ;;  %972 = vmatprep.mubr.f32.mxu1 %v508_v1 }
 0x149   : > { %973 = vmatmul.mubr.f32.vlgmr.msra.gmra.mxu1 %v509_v2  ;;  %628 = vmatprep.mubr.f32.mxu0 %v1206_v0 }
 0x14c   : > { %629 = vmatmul.mubr.f32.gmra.mxu0 %v509_v2 }
 0x208   : > { %v624_v3 = vpop.f32.mrf.mxu0 }
 0x209   : > { %v974_v4 = vpop.f32.mrf.mxu1  ;;  %v710_v10 = vrot.slane %v624_v3, 7 }
 0x20a   : > { %v626_v5 = vpop.f32.mrf.mxu0  ;;  %v717_v7 = vrot.slane %v974_v4, 1 }
 0x20b   : > { %v701_v6 = vpop.f32.mrf.mxu1 }
 0x20c   : > { %v716_v8 = vrot.slane %v701_v6, 1  ;;  %v630_v9 = vpop.f32.mrf.mxu0 }
 0x20d   : > { %v711_v11 = vrot.slane %v630_v9, 7 }
 0x20e   : > { %v719_v12 = vsel %vm490_vm2, %v717_v7, %v716_v8  ;;  %v632_v13 = vpop.f32.mrf.mxu0  ;;  %v718_v20 = vsel %vm490_vm2, %v716_v8, %v717_v7 }
 0x20f   : > { %v713_v14 = vsel %vm483_vm1, %v711_v11, %v710_v10  ;;  %v712_v15 = vsel %vm483_vm1, %v710_v10, %v711_v11  ;;  %v721_v18 = vsel %vm280_vm3, 0.0, %v719_v12 }
 0x210   : > { %v714_v0 = vsel %vm277_vm0, 0.0, %v713_v14  ;;  %v723_v16 = vadd.f32 %v712_v15, %v632_v13 }
 0x211   : > { %v722_v17 = vadd.f32 %v714_v0, %v626_v5 }
 0x212   : > { %v725_v21 = vadd.f32 %v723_v16, %v721_v18 }
 0x213   : > { %v724_v22 = vadd.f32 %v722_v17, %v718_v20 }
 0x214   : > { %v734_v23 = vadd.f32 %v861_v19, %v725_v21 }
 0x215   : > { %v733_v24 = vadd.f32 %v861_v19, %v724_v22 }
 0x216   : > { %v736_v25 = vadd.f32 %v734_v23, %v1388_v50 }
 0x217   : > { %v735_v26 = vadd.f32 %v733_v24, %v1385_v49 }
 0x218   : > { %v738_v27 = vmax.f32 %v736_v25, 0.0 }
 0x219   : > { %v737_v28 = vmax.f32 %v735_v26, 0.0 }
 0x21a   : > { %740 = vst [vmem:[%s271_s12 + $0x8] sm:$0xff] %v738_v27 }
 0x21b   : > { %739 = vst [vmem:[%s271_s12] sm:$0xff] %v737_v28 }
 0x21c   : > { %1142 = shalt.err (!%p1139_p9)
}
 0x21d   : > { %s1143_s30 = scalar_lea.hbm %s1423_s9, 256  ;;  %s1147_s8 = scalar_lea.hbm %s1473_s5, 512 }
 0x21e   : > { %p1144_p13 = scmp.ne.s32.totalorder %s1423_s9, %s1143_s30  ;;  %p1148_p4 = scmp.lt.s32.totalorder %s1423_s9, %s1473_s5 }
 0x21f   : > { %p1149_p8 = scmp.lt.s32.totalorder %s1147_s8, %s1143_s30 }
 0x220   : > { %p1145_p5 = pnand %p1144_p13, %p1489_p10 }
 0x221   : > { %p1150_p3 = por %p1149_p8, %p1148_p4 }
 0x222   : > { %p1146_p0 = pneg %p1145_p5 }
 0x224   : > { %p1151_p11 = pnand %p1150_p3, %p1146_p0 }
 0x226   : > { %1154 = shalt.err (!%p1151_p11)
}
 0x227   : > { %s1208_s12 = smov 128   ;;  %s1209_s6 = smov 8  }
 0x228   : > { %985 = dma.vmem_to_hbm [thread:$0]  (%p1489_p10), %s1425_s28, 256, %s1423_s9, %s742_s22, %s1208_s12, %s1208_s12, %s1209_s6  }
 0x229 PF: > { %s770_s7 = sand.u32 1, %s1185_s18   ;;  %p1490_p1 = scmp.ne.s32.totalorder %s1479_s25, 0 }
 0x22a   : > { %p1491_p2 = scmp.ge.s32.totalorder %s1197_s21, 2  ;;  %s771_s13 = scalar_lea.sflag [#allocation4], %s770_s7 }
 0x22c   : > { %p999_p6 = pnand %p1491_p2, %p1490_p1 }
 0x22e   : > { %p1000_p12 = pneg %p999_p6 }
 0x230   : > { %1180 = dma.done.wait (%p1000_p12), %s771_s13, 256  }
 0x231   : > { %1182 = vsyncadd (%p1000_p12), %s771_s13, 4294967040  ;;  %p19_p7 = scmp.ge.s32.totalorder %s1312_s15, 4   ;;  %s1492_s18 = smov %s1189_s19 }
 0x232   : > { %s1493_s19 = smov %s1193_s20  ;;  %s1494_s20 = smov %s1328_s27 }
 0x233   : > { %s1495_s21 = smov %s1312_s15  ;;  %21 = sbr.rel (!%p19_p7) target bundleno = 6 (0x6), region = 93 }
 0x238   :  { %776 = vsyncpa [#allocation3], 1 }
 0x239   :  { %778 = vsyncpa [#allocation3 + $0x1], 1 }
 0x23a   :  { %779 = vsyncpa [#allocation6], 1 }
 0x23b   :  { %780 = vsyncpa [#allocation4], 1 }
 0x23c   :  { %782 = vsyncpa [#allocation4 + $0x1], 1 }

</bundles_post_ra>
